<compile_context>
chip_gen: v6e
topology: v6e:2x2x1
jax: 0.10.0
libtpu: 0.0.40
codegen_flags: <defaults>
</compile_context>

<pallas_src>
import functools

import jax
import jax.numpy as jnp
from jax import lax
from jax.experimental import pallas as pl
from jax.experimental.pallas import tpu as pltpu

BN_EPS = 1e-5                  # nn.BatchNorm1d default
MAX_BATCH_TILE = 512           # >=512-row tiles reach ~85% of HBM roofline
VMEM_LIMIT = 32 * 1024 * 1024  # explicit scoped-VMEM budget (safe on v5e/v6e/v7x)


def _stats_kernel(x_ref, w1_ref, gb_ref, ss_ref, *, batch):
    """Pass 1: accumulate full-batch per-feature sum / sum-of-squares of h = x @ w1
    across the 'arbitrary' batch-tile axis, then fold BN into fused (scale, shift)
    on the last grid step.  fc1 bias is omitted (cancelled by BN mean subtraction)."""
    i = pl.program_id(0)
    tb = x_ref.shape[0]

    @pl.when(i == 0)
    def _init():
        ss_ref[...] = jnp.zeros_like(ss_ref)

    # fc1 on the MXU: bf16 operands, f32 accumulation.
    h = jnp.dot(x_ref[...].astype(jnp.bfloat16), w1_ref[...],
                preferred_element_type=jnp.float32)            # (tb, hid) f32

    # Mask rows of a partial last tile so they do not pollute the batch stats.
    row = i * tb + lax.broadcasted_iota(jnp.int32, h.shape, 0)
    h = jnp.where(row < batch, h, 0.0)

    s1 = jnp.sum(h, axis=0, keepdims=True)                     # (1, hid)
    s2 = jnp.sum(h * h, axis=0, keepdims=True)                 # (1, hid)
    ss_ref[...] += jnp.concatenate([s1, s2], axis=0)           # (2, hid) accumulator

    @pl.when(i == pl.num_programs(0) - 1)
    def _finalize():
        gamma = gb_ref[0:1, :]
        beta = gb_ref[1:2, :]
        inv_b = 1.0 / batch
        acc = ss_ref[...]
        mean = acc[0:1, :] * inv_b
        var = jnp.maximum(acc[1:2, :] * inv_b - mean * mean, 0.0)  # clamp cancellation
        scale = gamma * lax.rsqrt(var + BN_EPS)                    # EUP rsqrt
        shift = beta - mean * scale
        ss_ref[...] = jnp.concatenate([scale, shift], axis=0)      # (2, hid)


def _apply_kernel(x_ref, w1_ref, w2_ref, ss_ref, b2_ref, o_ref):
    """Pass 2 ('parallel' over batch tiles): recompute h, apply fused BN scale/shift
    + ReLU in f32, then fc2 (+ bias).  Output stored at its true (tb, out_dim)."""
    h = jnp.dot(x_ref[...].astype(jnp.bfloat16), w1_ref[...],
                preferred_element_type=jnp.float32)            # (tb, hid) f32
    scale = ss_ref[0:1, :]
    shift = ss_ref[1:2, :]
    h = jnp.maximum(h * scale + shift, 0.0)                    # BN + ReLU (f32 VPU)
    out = jnp.dot(h.astype(jnp.bfloat16), w2_ref[...],
                  preferred_element_type=jnp.float32) + b2_ref[...]
    o_ref[...] = out.astype(o_ref.dtype)


def pack_predictor_params(w1, gamma, beta, w2, b2):
    """One-time host-side packing: weights to bf16 for the MXU; the tiny BN/bias rows
    stay f32.  fc1 bias is intentionally dropped (exact cancellation under
    training-mode BatchNorm)."""
    w1_p = jnp.asarray(w1, jnp.bfloat16)                        # (in_dim, hid)
    w2_p = jnp.asarray(w2, jnp.bfloat16)                        # (hid, out_dim)
    gb = jnp.stack([jnp.asarray(gamma, jnp.float32),
                    jnp.asarray(beta, jnp.float32)], axis=0)    # (2, hid)
    b2r = jnp.asarray(b2, jnp.float32).reshape(1, -1)           # (1, out_dim)
    return w1_p, w2_p, gb, b2r


@jax.jit
def predictor_forward(x, w1_p, w2_p, gb, b2r):
    x = x.astype(jnp.float32)
    B, in_dim = x.shape
    hid = w1_p.shape[1]
    out_dim = w2_p.shape[1]

    tb = B if B <= MAX_BATCH_TILE else MAX_BATCH_TILE
    nb = pl.cdiv(B, tb)

    def full(shape):
        return pl.BlockSpec(shape, lambda i: (0, 0))

    # ---- Pass 1: full-batch BN statistics -> fused (scale, shift) --------------
    ss = pl.pallas_call(
        functools.partial(_stats_kernel, batch=B),
        out_shape=jax.ShapeDtypeStruct((2, hid), jnp.float32),
        grid=(nb,),
        in_specs=[pl.BlockSpec((tb, in_dim), lambda i: (i, 0)),
                  full((in_dim, hid)),
                  full((2, hid))],
        out_specs=full((2, hid)),   # resident accumulator across the batch axis
        compiler_params=pltpu.CompilerParams(
            dimension_semantics=("arbitrary",),
            vmem_limit_bytes=VMEM_LIMIT),
    )(x, w1_p, gb)

    # ---- Pass 2: normalize + ReLU + fc2 (batch axis parallel -> v7x megacore) --
    out = pl.pallas_call(
        _apply_kernel,
        out_shape=jax.ShapeDtypeStruct((B, out_dim), jnp.float32),
        grid=(nb,),
        in_specs=[pl.BlockSpec((tb, in_dim), lambda i: (i, 0)),
                  full((in_dim, hid)),
                  full((hid, out_dim)),
                  full((2, hid)),
                  full((1, out_dim))],
        out_specs=pl.BlockSpec((tb, out_dim), lambda i: (i, 0)),
        compiler_params=pltpu.CompilerParams(
            dimension_semantics=("parallel",),
            vmem_limit_bytes=VMEM_LIMIT),
    )(x, w1_p, w2_p, ss, b2r)
    return out


def reference_forward(x, w1, b1, gamma, beta, w2, b2):
    """Pure-JAX reference with the ORIGINAL (f32, bias-included) math."""
    h = x @ w1 + b1
    mean = h.mean(axis=0, keepdims=True)
    var = ((h - mean) ** 2).mean(axis=0, keepdims=True)
    h = (h - mean) / jnp.sqrt(var + BN_EPS) * gamma + beta
    h = jnp.maximum(h, 0.0)
    return h @ w2 + b2


if __name__ == "__main__":
    # Small, forward-consistent shapes (B multiple of 8 sublanes)
    B, in_dim, hidden_dim, out_dim = 8, 16, 32, 16

    key = jax.random.PRNGKey(0)
    kx, kw1, kb1, kg, kb, kw2, kb2 = jax.random.split(key, 7)

    x = jax.random.normal(kx, (B, in_dim), dtype=jnp.float32)

    # Deterministic synthetic parameters (not a checkpoint load)
    w1 = jax.random.normal(kw1, (in_dim, hidden_dim), dtype=jnp.float32) * 0.1
    b1 = jax.random.normal(kb1, (hidden_dim,), dtype=jnp.float32) * 0.01  # dead under BN
    gamma = 1.0 + 0.1 * jax.random.normal(kg, (hidden_dim,), dtype=jnp.float32)
    beta = 0.1 * jax.random.normal(kb, (hidden_dim,), dtype=jnp.float32)
    w2 = jax.random.normal(kw2, (hidden_dim, out_dim), dtype=jnp.float32) * 0.1
    b2 = jax.random.normal(kb2, (out_dim,), dtype=jnp.float32) * 0.01

    w1_p, w2_p, gb, b2r = pack_predictor_params(w1, gamma, beta, w2, b2)

    out = jax.block_until_ready(predictor_forward(x, w1_p, w2_p, gb, b2r))

    ref = reference_forward(x, w1, b1, gamma, beta, w2, b2)
    assert out.shape == (B, out_dim)
    # bf16 MXU operands -> looser tolerance than the old all-f32 version
    assert jnp.allclose(out, ref, atol=3e-2, rtol=3e-2), (
        f"mismatch vs JAX reference, max abs err {float(jnp.max(jnp.abs(out - ref)))}")

    print("KERNEL_OK")
</pallas_src>

<mosaic_0001>
module attributes {stable_mosaic.version = 11 : i64} {
  func.func @_apply_kernel(%arg0: i32, %arg1: memref<8x16xf32, #tpu.memory_space<vmem>>, %arg2: memref<16x32xbf16, #tpu.memory_space<vmem>>, %arg3: memref<32x16xbf16, #tpu.memory_space<vmem>>, %arg4: memref<2x32xf32, #tpu.memory_space<vmem>>, %arg5: memref<1x16xf32, #tpu.memory_space<vmem>>, %arg6: memref<8x16xf32, #tpu.memory_space<vmem>>) attributes {dimension_semantics = [#tpu.dimension_semantics<parallel>], iteration_bounds = array<i64: 1>, scalar_prefetch = 0 : i64, scratch_operands = 0 : i64, tpu.core_type = #tpu.core_type<tc>, window_params = [{transform_indices = @transform_0, window_bounds = array<i64: 8, 16>}, {pipeline_mode = #tpu.pipeline_mode<synchronous>, transform_indices = @transform_1, window_bounds = array<i64: 16, 32>}, {pipeline_mode = #tpu.pipeline_mode<synchronous>, transform_indices = @transform_2, window_bounds = array<i64: 32, 16>}, {pipeline_mode = #tpu.pipeline_mode<synchronous>, transform_indices = @transform_3, window_bounds = array<i64: 2, 32>}, {pipeline_mode = #tpu.pipeline_mode<synchronous>, transform_indices = @transform_4, window_bounds = array<i64: 1, 16>}, {transform_indices = @transform_5, window_bounds = array<i64: 8, 16>}]} {
    %c0 = arith.constant 0 : index
    %c0_0 = arith.constant 0 : index
    %0 = vector.load %arg1[%c0, %c0_0] : memref<8x16xf32, #tpu.memory_space<vmem>>, vector<8x16xf32>
    %1 = arith.truncf %0 : vector<8x16xf32> to vector<8x16xbf16>
    %c0_1 = arith.constant 0 : index
    %c0_2 = arith.constant 0 : index
    %2 = vector.load %arg2[%c0_1, %c0_2] : memref<16x32xbf16, #tpu.memory_space<vmem>>, vector<16x32xbf16>
    %cst = arith.constant dense<0.000000e+00> : vector<8x32xf32>
    %3 = tpu.matmul %1, %2, %cst {dimension_numbers = #tpu.dot_dimension_numbers<[1], [0], [0], [1], [0, 0, 1, 1], [], []>} : vector<8x16xbf16>, vector<16x32xbf16>, vector<8x32xf32> -> vector<8x32xf32>
    %c0_3 = arith.constant 0 : index
    %c0_4 = arith.constant 0 : index
    %4 = vector.load %arg4[%c0_3, %c0_4] : memref<2x32xf32, #tpu.memory_space<vmem>>, vector<1x32xf32>
    %c1 = arith.constant 1 : index
    %c0_5 = arith.constant 0 : index
    %5 = vector.load %arg4[%c1, %c0_5] : memref<2x32xf32, #tpu.memory_space<vmem>>, vector<1x32xf32>
    %6 = vector.broadcast %4 : vector<1x32xf32> to vector<8x32xf32>
    %7 = arith.mulf %3, %6 : vector<8x32xf32>
    %8 = vector.broadcast %5 : vector<1x32xf32> to vector<8x32xf32>
    %9 = arith.addf %7, %8 : vector<8x32xf32>
    %cst_6 = arith.constant 0.000000e+00 : f32
    %10 = vector.broadcast %cst_6 : f32 to vector<8x32xf32>
    %11 = arith.maximumf %9, %10 : vector<8x32xf32>
    %12 = arith.truncf %11 : vector<8x32xf32> to vector<8x32xbf16>
    %c0_7 = arith.constant 0 : index
    %c0_8 = arith.constant 0 : index
    %13 = vector.load %arg3[%c0_7, %c0_8] : memref<32x16xbf16, #tpu.memory_space<vmem>>, vector<32x16xbf16>
    %cst_9 = arith.constant dense<0.000000e+00> : vector<8x16xf32>
    %14 = tpu.matmul %12, %13, %cst_9 {dimension_numbers = #tpu.dot_dimension_numbers<[1], [0], [0], [1], [0, 0, 1, 1], [], []>} : vector<8x32xbf16>, vector<32x16xbf16>, vector<8x16xf32> -> vector<8x16xf32>
    %c0_10 = arith.constant 0 : index
    %c0_11 = arith.constant 0 : index
    %15 = vector.load %arg5[%c0_10, %c0_11] : memref<1x16xf32, #tpu.memory_space<vmem>>, vector<1x16xf32>
    %16 = vector.broadcast %15 : vector<1x16xf32> to vector<8x16xf32>
    %17 = arith.addf %14, %16 : vector<8x16xf32>
    %c0_12 = arith.constant 0 : index
    %c0_13 = arith.constant 0 : index
    %18 = vector.load %arg6[%c0_12, %c0_13] : memref<8x16xf32, #tpu.memory_space<vmem>>, vector<8x16xf32>
    tpu.vector_store %arg6[%c0_12, %c0_13], %17 {strides = array<i32>} : memref<8x16xf32, #tpu.memory_space<vmem>>, vector<8x16xf32>,
    return
  }
  func.func @transform_0(%arg0: i32) -> (i32, i32) {
    %c0_i32 = arith.constant 0 : i32
    %c0_i32_0 = arith.constant 0 : i32
    return %arg0, %c0_i32 : i32, i32
  }
  func.func @transform_1(%arg0: i32) -> (i32, i32) {
    %c0_i32 = arith.constant 0 : i32
    %c0_i32_0 = arith.constant 0 : i32
    %c0_i32_1 = arith.constant 0 : i32
    return %c0_i32, %c0_i32_0 : i32, i32
  }
  func.func @transform_2(%arg0: i32) -> (i32, i32) {
    %c0_i32 = arith.constant 0 : i32
    %c0_i32_0 = arith.constant 0 : i32
    %c0_i32_1 = arith.constant 0 : i32
    return %c0_i32, %c0_i32_0 : i32, i32
  }
  func.func @transform_3(%arg0: i32) -> (i32, i32) {
    %c0_i32 = arith.constant 0 : i32
    %c0_i32_0 = arith.constant 0 : i32
    %c0_i32_1 = arith.constant 0 : i32
    return %c0_i32, %c0_i32_0 : i32, i32
  }
  func.func @transform_4(%arg0: i32) -> (i32, i32) {
    %c0_i32 = arith.constant 0 : i32
    %c0_i32_0 = arith.constant 0 : i32
    %c0_i32_1 = arith.constant 0 : i32
    return %c0_i32, %c0_i32_0 : i32, i32
  }
  func.func @transform_5(%arg0: i32) -> (i32, i32) {
    %c0_i32 = arith.constant 0 : i32
    %c0_i32_0 = arith.constant 0 : i32
    return %arg0, %c0_i32 : i32, i32
  }
}

module attributes {stable_mosaic.version = 11 : i64} {
  func.func @_stats_kernel(%arg0: i32, %arg1: memref<8x16xf32, #tpu.memory_space<vmem>>, %arg2: memref<16x32xbf16, #tpu.memory_space<vmem>>, %arg3: memref<2x32xf32, #tpu.memory_space<vmem>>, %arg4: memref<2x32xf32, #tpu.memory_space<vmem>>) attributes {dimension_semantics = [#tpu.dimension_semantics<arbitrary>], iteration_bounds = array<i64: 1>, scalar_prefetch = 0 : i64, scratch_operands = 0 : i64, tpu.core_type = #tpu.core_type<tc>, window_params = [{transform_indices = @transform_0, window_bounds = array<i64: 8, 16>}, {pipeline_mode = #tpu.pipeline_mode<synchronous>, transform_indices = @transform_1, window_bounds = array<i64: 16, 32>}, {pipeline_mode = #tpu.pipeline_mode<synchronous>, transform_indices = @transform_2, window_bounds = array<i64: 2, 32>}, {pipeline_mode = #tpu.pipeline_mode<synchronous>, transform_indices = @transform_3, window_bounds = array<i64: 2, 32>}]} {
    %c0_i32 = arith.constant 0 : i32
    %0 = arith.cmpi eq, %arg0, %c0_i32 : i32
    %1 = arith.extui %0 : i1 to i32
    %c0_i32_0 = arith.constant 0 : i32
    %2 = arith.cmpi ne, %1, %c0_i32_0 : i32
    scf.if %2 {
      %cst_14 = arith.constant 0.000000e+00 : f32
      %27 = vector.broadcast %cst_14 : f32 to vector<2x32xf32>
      %c0_15 = arith.constant 0 : index
      %c0_16 = arith.constant 0 : index
      %28 = vector.load %arg4[%c0_15, %c0_16] : memref<2x32xf32, #tpu.memory_space<vmem>>, vector<2x32xf32>
      tpu.vector_store %arg4[%c0_15, %c0_16], %27 {strides = array<i32>} : memref<2x32xf32, #tpu.memory_space<vmem>>, vector<2x32xf32>,
    } else {
    }
    %c0 = arith.constant 0 : index
    %c0_1 = arith.constant 0 : index
    %3 = vector.load %arg1[%c0, %c0_1] : memref<8x16xf32, #tpu.memory_space<vmem>>, vector<8x16xf32>
    %4 = arith.truncf %3 : vector<8x16xf32> to vector<8x16xbf16>
    %c0_2 = arith.constant 0 : index
    %c0_3 = arith.constant 0 : index
    %5 = vector.load %arg2[%c0_2, %c0_3] : memref<16x32xbf16, #tpu.memory_space<vmem>>, vector<16x32xbf16>
    %cst = arith.constant dense<0.000000e+00> : vector<8x32xf32>
    %6 = tpu.matmul %4, %5, %cst {dimension_numbers = #tpu.dot_dimension_numbers<[1], [0], [0], [1], [0, 0, 1, 1], [], []>} : vector<8x16xbf16>, vector<16x32xbf16>, vector<8x32xf32> -> vector<8x32xf32>
    %c8_i32 = arith.constant 8 : i32
    %7 = arith.muli %arg0, %c8_i32 : i32
    %8 = tpu.iota {dimensions = array<i32: 0>} : vector<8x32xi32>
    %9 = vector.broadcast %7 : i32 to vector<8x32xi32>
    %10 = arith.addi %9, %8 : vector<8x32xi32>
    %c8_i32_4 = arith.constant 8 : i32
    %11 = vector.broadcast %c8_i32_4 : i32 to vector<8x32xi32>
    %12 = arith.cmpi slt, %10, %11 : vector<8x32xi32>
    %cst_5 = arith.constant 0.000000e+00 : f32
    %13 = vector.broadcast %cst_5 : f32 to vector<8x32xf32>
    %14 = arith.select %12, %6, %13 : vector<8x32xi1>, vector<8x32xf32>
    %cst_6 = arith.constant dense<0.000000e+00> : vector<32xf32>
    %15 = vector.multi_reduction <add>, %14, %cst_6 [0] : vector<8x32xf32> to vector<32xf32>
    %16 = vector.shape_cast %15 : vector<32xf32> to vector<1x32xf32>
    %17 = arith.mulf %14, %14 : vector<8x32xf32>
    %cst_7 = arith.constant dense<0.000000e+00> : vector<32xf32>
    %18 = vector.multi_reduction <add>, %17, %cst_7 [0] : vector<8x32xf32> to vector<32xf32>
    %19 = vector.shape_cast %18 : vector<32xf32> to vector<1x32xf32>
    %c0_8 = arith.constant 0 : index
    %c0_9 = arith.constant 0 : index
    %20 = vector.load %arg4[%c0_8, %c0_9] : memref<2x32xf32, #tpu.memory_space<vmem>>, vector<2x32xf32>
    %21 = tpu.concatenate %16, %19 in 0 : vector<1x32xf32>, vector<1x32xf32> -> vector<2x32xf32>
    %22 = arith.addf %20, %21 : vector<2x32xf32>
    %c0_10 = arith.constant 0 : index
    %c0_11 = arith.constant 0 : index
    %23 = vector.load %arg4[%c0_10, %c0_11] : memref<2x32xf32, #tpu.memory_space<vmem>>, vector<2x32xf32>
    tpu.vector_store %arg4[%c0_10, %c0_11], %22 {strides = array<i32>} : memref<2x32xf32, #tpu.memory_space<vmem>>, vector<2x32xf32>,
    %c0_i32_12 = arith.constant 0 : i32
    %24 = arith.cmpi eq, %arg0, %c0_i32_12 : i32
    %25 = arith.extui %24 : i1 to i32
    %c0_i32_13 = arith.constant 0 : i32
    %26 = arith.cmpi ne, %25, %c0_i32_13 : i32
    scf.if %26 {
      %c0_14 = arith.constant 0 : index
      %c0_15 = arith.constant 0 : index
      %27 = vector.load %arg3[%c0_14, %c0_15] : memref<2x32xf32, #tpu.memory_space<vmem>>, vector<1x32xf32>
      %c1 = arith.constant 1 : index
      %c0_16 = arith.constant 0 : index
      %28 = vector.load %arg3[%c1, %c0_16] : memref<2x32xf32, #tpu.memory_space<vmem>>, vector<1x32xf32>
      %c0_17 = arith.constant 0 : index
      %c0_18 = arith.constant 0 : index
      %29 = vector.load %arg4[%c0_17, %c0_18] : memref<2x32xf32, #tpu.memory_space<vmem>>, vector<2x32xf32>
      %30 = vector.extract_strided_slice %29 {offsets = [0, 0], sizes = [1, 32], strides = [1, 1]} : vector<2x32xf32> to vector<1x32xf32>
      %cst_19 = arith.constant 1.250000e-01 : f32
      %31 = vector.broadcast %cst_19 : f32 to vector<1x32xf32>
      %32 = arith.mulf %30, %31 : vector<1x32xf32>
      %33 = vector.extract_strided_slice %29 {offsets = [1, 0], sizes = [1, 32], strides = [1, 1]} : vector<2x32xf32> to vector<1x32xf32>
      %cst_20 = arith.constant 1.250000e-01 : f32
      %34 = vector.broadcast %cst_20 : f32 to vector<1x32xf32>
      %35 = arith.mulf %33, %34 : vector<1x32xf32>
      %36 = arith.mulf %32, %32 : vector<1x32xf32>
      %37 = arith.subf %35, %36 : vector<1x32xf32>
      %cst_21 = arith.constant 0.000000e+00 : f32
      %38 = vector.broadcast %cst_21 : f32 to vector<1x32xf32>
      %39 = arith.maximumf %37, %38 : vector<1x32xf32>
      %cst_22 = arith.constant 9.99999974E-6 : f32
      %40 = vector.broadcast %cst_22 : f32 to vector<1x32xf32>
      %41 = arith.addf %39, %40 : vector<1x32xf32>
      %42 = math.rsqrt %41 : vector<1x32xf32>
      %43 = arith.mulf %27, %42 : vector<1x32xf32>
      %44 = arith.mulf %32, %43 : vector<1x32xf32>
      %45 = arith.subf %28, %44 : vector<1x32xf32>
      %46 = tpu.concatenate %43, %45 in 0 : vector<1x32xf32>, vector<1x32xf32> -> vector<2x32xf32>
      %c0_23 = arith.constant 0 : index
      %c0_24 = arith.constant 0 : index
      %47 = vector.load %arg4[%c0_23, %c0_24] : memref<2x32xf32, #tpu.memory_space<vmem>>, vector<2x32xf32>
      tpu.vector_store %arg4[%c0_23, %c0_24], %46 {strides = array<i32>} : memref<2x32xf32, #tpu.memory_space<vmem>>, vector<2x32xf32>,
    } else {
    }
    return
  }
  func.func @transform_0(%arg0: i32) -> (i32, i32) {
    %c0_i32 = arith.constant 0 : i32
    %c0_i32_0 = arith.constant 0 : i32
    return %arg0, %c0_i32 : i32, i32
  }
  func.func @transform_1(%arg0: i32) -> (i32, i32) {
    %c0_i32 = arith.constant 0 : i32
    %c0_i32_0 = arith.constant 0 : i32
    %c0_i32_1 = arith.constant 0 : i32
    return %c0_i32, %c0_i32_0 : i32, i32
  }
  func.func @transform_2(%arg0: i32) -> (i32, i32) {
    %c0_i32 = arith.constant 0 : i32
    %c0_i32_0 = arith.constant 0 : i32
    %c0_i32_1 = arith.constant 0 : i32
    return %c0_i32, %c0_i32_0 : i32, i32
  }
  func.func @transform_3(%arg0: i32) -> (i32, i32) {
    %c0_i32 = arith.constant 0 : i32
    %c0_i32_0 = arith.constant 0 : i32
    %c0_i32_1 = arith.constant 0 : i32
    return %c0_i32, %c0_i32_0 : i32, i32
  }
}

</mosaic_0001>

<bundles_post_ra>
// kernel: predictor_forward.3
= control target key start
LH: loop header
LB: loop body
LE: loop exit
PB: predicated region body
PF: predicated region fallthrough
CT: control target
= control target key end

     0   :  { %v227_v1 = vmov 0.0   ;;  %vm32_vm0 = vcmask 130048   ;;  %vm228_vm1 = vmmov 0   ;;  %s286_s0 = inlined_call_operand.vmem [shape: f32[8,16], index: 0, kind: input, shape index: {}]   ;;  %s287_s1 = inlined_call_operand.vmem [shape: bf16[16,32], index: 1, kind: input, shape index: {}]   ;;  %s288_s2 = inlined_call_operand.vmem [shape: bf16[32,16], index: 2, kind: input, shape index: {}]   ;;  %s289_s3 = inlined_call_operand.vmem [shape: f32[2,32], index: 3, kind: input, shape index: {}]   ;;  %s290_s4 = inlined_call_operand.vmem [shape: f32[1,16], index: 4, kind: input, shape index: {}]   ;;  %s291_s5 = inlined_call_operand.hbm [shape: f32[8,16], index: 5, kind: output, shape index: {}]  }
   0x1   :  { %v202_v0 = vld [vmem:[%s287_s1] sm:$0xff]   ;;  %185 = vmatprep.subr.bf16.mxu0 %v227_v1  ;;  %191 = vmatprep.subr.bf16.mxu1 %v227_v1 }
   0x2   :  { %v22_v2 = vld [vmem:[%s286_s0] sm:$0xff]  ;;  %186 = vmatpush3.bf16.msra.mxu0 %v202_v0  ;;  %187 = vmatprep.mubr.msk.bf16.mxu0 %vm228_vm1, %v227_v1 }
   0x3   :  { %v23_v3 = vpack.c.bf16 %v22_v2, %v22_v2  ;;  %195 = vmatprep.mubr.msk.bf16.mxu1 %vm228_vm1, %v227_v1 }
   0x4   :  { %10 = vsyncpa [#allocation3], 0  ;;  %v203_v4 = vld [vmem:[%s288_s2 + $0x8] sm:$0xff]   ;;  %v204_v5 = vld [vmem:[%s288_s2] sm:$0xff]   ;;  %vm113_vm2 = vcmask 261120   ;;  %s229_s29 = smov [#allocation2]  }
   0x5   :  { %188 = vmatmul.mubr.msk.bf16.vlgmr.msra.gmra.mxu0 %vm32_vm0, %v23_v3  ;;  %192 = vmatpush3.bf16.msra.mxu1 %v203_v4  ;;  %v174_v6 = vld [vmem:[%s289_s3] ss:$0 sm:$0xff]  ;;  %v175_v8 = vld [vmem:[%s289_s3 + $0x1] ss:$0 sm:$0xff]  ;;  %s164_s30 = sshll.u32 %s229_s29, 4  ;;  %s165_s30 = int_to_ptr.vmem [resolvable:$true] %s164_s30 }
   0x6   :  { %193 = vmatprep.subr.bf16.mxu1 %v227_v1  ;;  %v176_v16 = vld [vmem:[%s290_s4] ss:$0 sm:$0xff]  ;;  %s205_s3 = scalar_lea.vmem %s165_s30, 128  ;;  %p210_p1 = scmp.lt.s32.totalorder %s165_s30, %s165_s30 }
   0x7   :  { %p206_p0 = scmp.ne.s32.totalorder %s165_s30, %s205_s3  ;;  %p211_p2 = scmp.lt.s32.totalorder %s205_s3, %s205_s3 }
   0x9   :  { %194 = vmatpush3.bf16.msra.mxu1 %v204_v5  ;;  %p212_p3 = por %p211_p2, %p210_p1 }
   0xb   :  { %p213_p4 = pnand %p212_p3, %p206_p0 }
  0xc5   :  { %v70_v7 = vpop.f32.mrf.mxu0 }
  0xc6   :  { %v82_v9 = vmul.f32 %v174_v6, %v70_v7 }
  0xc7   :  { %v189_v10 = vpop.f32.mrf.mxu0 }
  0xc8   :  { %v87_v11 = vadd.f32 %v175_v8, %v82_v9 }
  0xc9   :  { %v73_v12 = vpop.f32.mrf.mxu0 }
  0xca   :  { %v88_v13 = vmax.f32 %v87_v11, 0.0 }
  0xcb   :  { %v190_v14 = vpop.f32.mrf.mxu0 }
  0xcc   :  { %v89_v15 = vpack.c.bf16 %v88_v13, %v88_v13 }
  0xce   :  { %196 = vmatmul.mubr.msk.bf16.vlgmr.msra.gmra.mxu1 %vm113_vm2, %v89_v15 }
 0x18e   :  { %v151_v17 = vpop.f32.mrf.mxu1 }
 0x18f   :  { %v152_v18 = vadd.f32 %v176_v16, %v151_v17 }
 0x190   :  { %v197_v19 = vpop.f32.mrf.mxu1 }
 0x191   :  { %157 = vst.msk [vmem:[#allocation2] sm:$0xff] %vm32_vm0, %v152_v18 }
 0x192   :  { %v154_v20 = vpop.f32.mrf.mxu1 }
 0x193   :  { %216 = shalt.err (!%p213_p4)
}
 0x194   :  { %167 = dma.vmem_to_hbm [thread:$0]  %s165_s30, 128, %s291_s5, [#allocation3]   ;;  %v198_v21 = vpop.f32.mrf.mxu1 }
 0x195   :  { %225 = dma.done.wait [#allocation3], 128  }
 0x196   :  { %226 = vsyncadd [#allocation3], 4294967168 }
 0x197   :  { %171 = vsyncpa [#allocation3], 1 }

// kernel: predictor_forward.2
= control target key start
LH: loop header
LB: loop body
LE: loop exit
PB: predicated region body
PF: predicated region fallthrough
CT: control target
= control target key end

     0   :  { %8 = vsyncpa [#allocation3], 0  ;;  %s313_s0 = inlined_call_operand.hbm [shape: f32[8,16], index: 0, kind: input, shape index: {}]   ;;  %s314_s1 = inlined_call_operand.hbm [shape: bf16[16,32], index: 1, kind: input, shape index: {}]   ;;  %s315_s2 = inlined_call_operand.hbm [shape: f32[2,32], index: 2, kind: input, shape index: {}]   ;;  %s316_s3 = inlined_call_operand.vmem [shape: f32[2,32], index: 3, kind: output, shape index: {}]  }
   0x1   :  { %9 = vsyncpa [#allocation5], 0  ;;  %s257_s12 = smov [#allocation4]  }
   0x2   :  { %s25_s13 = sshll.u32 %s257_s12, 4  ;;  %s26_s13 = int_to_ptr.vmem [resolvable:$true] %s25_s13 }
   0x3   :  { %s201_s14 = scalar_lea.vmem %s26_s13, 128  ;;  %p206_p1 = scmp.lt.s32.totalorder %s26_s13, %s26_s13 }
   0x4   :  { %p202_p0 = scmp.ne.s32.totalorder %s26_s13, %s201_s14  ;;  %p207_p2 = scmp.lt.s32.totalorder %s201_s14, %s201_s14 }
   0x6   :  { %p208_p3 = por %p207_p2, %p206_p1 }
   0x8   :  { %p209_p4 = pnand %p208_p3, %p202_p0 }
   0xa   :  { %212 = shalt.err (!%p209_p4)
}
   0xb   :  { %s258_s15 = smov 64   ;;  %s259_s16 = smov 4  }
   0xc   :  { %31 = dma.hbm_to_vmem [thread:$0]  %s314_s1, 128, %s26_s13, [#allocation5], %s258_s15, %s258_s15, %s259_s16  }
   0xd   :  { %s260_s19 = smov [#allocation2]   ;;  %s261_s21 = smov [#allocation6]  }
   0xe   :  { %s16_s20 = sshll.u32 %s260_s19, 4  ;;  %s38_s22 = sshll.u32 %s261_s21, 4  ;;  %s17_s20 = int_to_ptr.vmem [resolvable:$true] %s16_s20  ;;  %s39_s22 = int_to_ptr.vmem [resolvable:$true] %s38_s22 }
   0xf   :  { %s221_s23 = scalar_lea.vmem %s17_s20, 128  ;;  %p226_p6 = scmp.lt.s32.totalorder %s17_s20, %s17_s20 }
  0x10   :  { %p222_p5 = scmp.ne.s32.totalorder %s17_s20, %s221_s23  ;;  %p227_p7 = scmp.lt.s32.totalorder %s221_s23, %s221_s23 }
  0x12   :  { %p228_p8 = por %p227_p7, %p226_p6 }
  0x14   :  { %p229_p9 = pnand %p228_p8, %p222_p5 }
  0x16   :  { %232 = shalt.err (!%p229_p9)
}
  0x17   :  { %19 = dma.hbm_to_vmem [thread:$0]  %s313_s0, 128, %s17_s20, [#allocation3]  }
  0x18   :  { %s241_s26 = scalar_lea.vmem %s39_s22, 32  ;;  %p246_p11 = scmp.lt.s32.totalorder %s39_s22, %s39_s22 }
  0x19   :  { %p242_p10 = scmp.ne.s32.totalorder %s39_s22, %s241_s26  ;;  %p247_p12 = scmp.lt.s32.totalorder %s241_s26, %s241_s26 }
  0x1b   :  { %p248_p13 = por %p247_p12, %p246_p11 }
  0x1d   :  { %p249_p0 = pnand %p248_p13, %p242_p10 }
  0x1f   :  { %252 = shalt.err (!%p249_p0)
}
  0x20   :  { %41 = dma.hbm_to_vmem [thread:$0]  %s315_s2, 32, %s39_s22, [#allocation5]  }
  0x21   :  { %253 = dma.done.wait [#allocation3], 128  }
  0x22   :  { %254 = vsyncadd [#allocation3], 4294967168 }
  0x23   :  { %255 = dma.done.wait [#allocation5], 160  }
  0x24   :  { %256 = vsyncadd [#allocation5], 4294967136  ;;  %vm56_vm0 = vcmask 254976   ;;  %v262_v0 = vmov 0.0   ;;  %vm263_vm1 = vmmov 0   ;;  %v190_v1 = vld [vmem:[#allocation4] sm:$0xff]  }
  0x25   :  { %57 = vst.msk [vmem:[%s316_s3] sm:$0x3] %vm56_vm0, %v262_v0  ;;  %177 = vmatprep.subr.bf16.mxu0 %v262_v0  ;;  %179 = vmatprep.mubr.msk.bf16.mxu0 %vm263_vm1, %v262_v0  ;;  %v58_v2 = vld [vmem:[#allocation2] sm:$0xff]  ;;  %vm68_vm2 = vcmask 130048   ;;  %vm119_vm3 = vcmask 261120   ;;  %vm136_vm4 = vcmask 1040384  }
  0x26   :  { %178 = vmatpush3.bf16.msra.mxu0 %v190_v1  ;;  %v59_v3 = vpack.c.bf16 %v58_v2, %v58_v2  ;;  %v144_v34 = vld [vmem:[#allocation6] sm:$0x1]  ;;  %v145_v37 = vld [vmem:[#allocation6 + $0x1] sm:$0x1] }
  0x29   :  { %180 = vmatmul.mubr.msk.bf16.vlgmr.msra.gmra.mxu0 %vm68_vm2, %v59_v3 }
  0x2c   :  { %v135_v23 = vld [vmem:[%s316_s3] sm:$0x3] }
  0xe9   :  { %v106_v4 = vpop.f32.mrf.mxu0 }
  0xea   :  { %v120_v5 = vsel %vm119_vm3, %v106_v4, 0.0  ;;  %v127_v6 = vmul.f32 %v106_v4, %v106_v4 }
  0xeb   :  { %v121_v7 = vrot.slane %v120_v5, 4  ;;  %v181_v8 = vpop.f32.mrf.mxu0 }
  0xec   :  { %v128_v9 = vsel %vm119_vm3, %v127_v6, 0.0 }
  0xed   :  { %v122_v10 = vadd.f32 %v121_v7, %v120_v5  ;;  %v129_v11 = vrot.slane %v128_v9, 4  ;;  %v109_v12 = vpop.f32.mrf.mxu0 }
  0xef   :  { %v123_v13 = vrot.slane %v122_v10, 2  ;;  %v130_v14 = vadd.f32 %v129_v11, %v128_v9  ;;  %v182_v15 = vpop.f32.mrf.mxu0 }
  0xf1   :  { %v124_v16 = vadd.f32 %v123_v13, %v122_v10  ;;  %v131_v17 = vrot.slane %v130_v14, 2 }
  0xf3   :  { %v125_v18 = vrot.slane %v124_v16, 1  ;;  %v132_v19 = vadd.f32 %v131_v17, %v130_v14 }
  0xf5   :  { %v133_v20 = vrot.slane %v132_v19, 1  ;;  %v126_v21 = vadd.f32 %v125_v18, %v124_v16 }
  0xf7   :  { %v134_v22 = vadd.f32 %v133_v20, %v132_v19 }
  0xf9   :  { %v137_v24 = vsel %vm136_vm4, %v126_v21, %v134_v22 }
  0xfa   :  { %v138_v25 = vadd.f32 %v137_v24, %v135_v23 }
  0xfc   :  { %140 = vst.msk [vmem:[%s316_s3] sm:$0x3] %vm56_vm0, %v138_v25 }
 0x103   :  { %v146_v26 = vld [vmem:[%s316_s3] sm:$0x3] }
 0x104   :  { %v147_v27 = vmul.f32 0.125, %v146_v26 }
 0x106   :  { %v148_v28 = vmul.f32 %v147_v27, %v147_v27 }
 0x108   :  { %v150_v29 = vrot.slane %v148_v28, 7 }
 0x10a   :  { %v152_v30 = vsub.f32 %v147_v27, %v150_v29 }
 0x10c   :  { %v153_v31 = vmax.f32 %v152_v30, 0.0 }
 0x10e   :  { %v154_v32 = vadd.f32 1e-05, %v153_v31 }
 0x110   :  { %191 = vrsqrt.f32 %v154_v32 }
 0x11d   :  { %v192_v33 = vpop.eup %191 }
 0x11e   :  { %v157_v35 = vrot.slane %v192_v33, 1 }
 0x120   :  { %v159_v36 = vmul.f32 %v157_v35, %v144_v34 }
 0x122   :  { %v160_v38 = vmul.f32 %v159_v36, %v147_v27 }
 0x124   :  { %v161_v39 = vsub.f32 %v145_v37, %v160_v38 }
 0x126   :  { %v163_v40 = vrot.slane %v161_v39, 7 }
 0x128   :  { %v165_v41 = vsel %vm136_vm4, %v159_v36, %v163_v40 }
 0x129   :  { %166 = vst.msk [vmem:[%s316_s3] sm:$0x3] %vm56_vm0, %v165_v41 }
 0x12a   :  { %171 = vsyncpa [#allocation3], 1 }
 0x12b   :  { %172 = vsyncpa [#allocation5], 1 }

</bundles_post_ra>
